<compile_context>
chip_gen: v7x
topology: tpu7x:2x2x1
jax: 0.10.0
libtpu: 0.0.40
codegen_flags: <defaults>
</compile_context>

<pallas_src>
import functools

import jax
import jax.numpy as jnp
import numpy as np
from jax import lax
from jax.experimental import pallas as pl
from jax.experimental.pallas import tpu as pltpu

LOSS_WEIGHT = 0.01
ALPHA = 0.05

_LANE = 128
_SUBLANE = 8


def _round_up(v, m):
    return (v + m - 1) // m * m


def _vmem_budget_bytes():
    """Conservative per-generation VMEM working-set budget (v7x has 64 MiB
    physical VMEM vs 128 MiB on v5e/v6e)."""
    try:
        vmem = pltpu.get_tpu_info().vmem_capacity_bytes
    except Exception:  # pragma: no cover - CPU tracing / older API
        return 10 * 1024 * 1024
    return max(8 * 1024 * 1024, min(vmem // 8, 16 * 1024 * 1024))


def _pick_batch_tile(batch, c_pad, d_pad, budget_bytes):
    """Largest batch tile whose working set fits the VMEM budget."""
    b_aligned = _round_up(batch, _SUBLANE)
    # Resident across the whole grid: centers-in and aliased centers-out blocks
    # (double-buffered by the pipeline) plus the scatter accumulator.
    resident = 5 * c_pad * d_pad * 4

    def working(tb):
        return (2 * tb * d_pad * 4      # double-buffered x tile
                + 2 * tb * c_pad * 4    # one-hot (+ any internal relayout)
                + 2 * tb * d_pad * 4)   # gathered centers + diff temporaries

    if b_aligned <= 512 and resident + working(b_aligned) <= budget_bytes:
        return b_aligned                # small batch: a single tile
    for tb in (512, 256, 128):          # large batch: lane-aligned tiles
        if tb <= b_aligned and resident + working(tb) <= budget_bytes:
            return tb
    return min(b_aligned, 128)


def _center_loss_kernel(x_ref, y_ref, centers_ref, loss_ref, new_centers_ref,
                        scatter_acc, count_acc, loss_acc, *, batch_true):
    step = pl.program_id(0)

    @pl.when(step == 0)
    def _init():
        scatter_acc[...] = jnp.zeros_like(scatter_acc)
        count_acc[...] = jnp.zeros_like(count_acc)
        loss_acc[...] = jnp.zeros_like(loss_acc)

    x = x_ref[...]                       # (TB, Dp) f32
    y = y_ref[...]                       # (TB, 1)  i32, -1 marks padding rows
    centers = centers_ref[...]           # (Cp, Dp) f32 (resident block)
    tb = x.shape[0]
    c_pad = centers.shape[0]

    # one-hot z[i, k] = (y[i] == k); padded rows (y == -1) give an all-zero row
    class_iota = lax.broadcasted_iota(jnp.int32, (tb, c_pad), 1)
    z = (class_iota == y).astype(jnp.float32)                       # (TB, Cp)

    # gather centers[y] on the MXU
    c = jnp.dot(z, centers, preferred_element_type=jnp.float32)     # (TB, Dp)
    diff = c - x                                                    # 0 on pad rows

    # running sum of squared errors (normalized once at finalize)
    loss_acc[...] += jnp.sum(diff * diff)

    # scatter-add of diff per class: contract the batch axis directly
    # (no explicit z.T in the kernel body).
    scatter_acc[...] += lax.dot_general(
        z, diff,
        dimension_numbers=(((0,), (0,)), ((), ())),
        preferred_element_type=jnp.float32)                         # (Cp, Dp)

    # per-class counts (accumulated; the "+1" is applied once at finalize)
    count_acc[...] += jnp.sum(z, axis=0, keepdims=True)             # (8, Cp) bcast

    @pl.when(step == pl.num_programs(0) - 1)
    def _finalize():
        loss_ref[...] = (LOSS_WEIGHT / batch_true) * loss_acc[...]
        # per-class factor: Cp divisions + one VPU multiply (not Cp*Dp divides)
        counts = jnp.transpose(count_acc[...])[:, 0:1]              # (Cp, 1)
        inv = ALPHA / (counts + 1.0)                                # (Cp, 1)
        new_centers_ref[...] = centers - scatter_acc[...] * inv


@functools.partial(jax.jit, static_argnames=("block_b",))
def center_loss(x, y, centers, *, block_b=None):
    """x: (B, D) f32, y: (B,) int, centers: (C, D) f32 ->
    (scalar loss f32, updated centers (C, D) f32)."""
    batch, dim = x.shape
    n_class = centers.shape[0]

    d_pad = _round_up(dim, _LANE)          # lane-dense last dim
    c_pad = _round_up(n_class, _SUBLANE)   # sublane-aligned class dim
    if block_b is None:
        tb = _pick_batch_tile(batch, c_pad, d_pad, _vmem_budget_bytes())
    else:
        tb = min(_round_up(int(block_b), _SUBLANE), _round_up(batch, _SUBLANE))
    b_pad = _round_up(batch, tb)
    grid = (b_pad // tb,)

    # Zero-pad D / C; pad batch rows with y = -1 and x = 0 so they contribute
    # exactly nothing to the loss, counts or the scatter-add.
    xp = jnp.zeros((b_pad, d_pad), jnp.float32).at[:batch, :dim].set(
        x.astype(jnp.float32))
    yp = jnp.full((b_pad, 1), -1, jnp.int32).at[:batch, 0].set(
        y.astype(jnp.int32))
    cp = jnp.zeros((c_pad, d_pad), jnp.float32).at[:n_class, :dim].set(
        centers.astype(jnp.float32))

    kernel = functools.partial(_center_loss_kernel, batch_true=batch)

    cost = pl.CostEstimate(
        flops=4 * b_pad * c_pad * d_pad + 6 * b_pad * d_pad,
        transcendentals=0,
        bytes_accessed=4 * (b_pad * d_pad + b_pad + 2 * c_pad * d_pad + 1),
    )

    loss2d, new_centers_p = pl.pallas_call(
        kernel,
        out_shape=(
            jax.ShapeDtypeStruct((1, 1), jnp.float32),
            jax.ShapeDtypeStruct((c_pad, d_pad), jnp.float32),
        ),
        grid=grid,
        in_specs=[
            pl.BlockSpec((tb, d_pad), lambda b: (b, 0)),      # x tile (pipelined)
            pl.BlockSpec((tb, 1), lambda b: (b, 0)),          # y tile
            pl.BlockSpec((c_pad, d_pad), lambda b: (0, 0)),   # centers (resident)
        ],
        out_specs=(
            pl.BlockSpec((1, 1), lambda b: (0, 0)),           # loss (final step only)
            pl.BlockSpec((c_pad, d_pad), lambda b: (0, 0)),   # updated centers
        ),
        scratch_shapes=[
            pltpu.VMEM((c_pad, d_pad), jnp.float32),          # scatter-add accumulator
            pltpu.VMEM((_SUBLANE, c_pad), jnp.float32),       # per-class counts
            pltpu.VMEM((1, 1), jnp.float32),                  # running SSE
        ],
        # centers is fully read, then fully overwritten -> reuse its HBM buffer
        # for the output (matches the in-place PyTorch buffer update).
        input_output_aliases={2: 1},
        compiler_params=pltpu.CompilerParams(
            dimension_semantics=("arbitrary",),               # batch axis is a reduction
        ),
        cost_estimate=cost,
    )(xp, yp, cp)

    return loss2d[0, 0], new_centers_p[:n_class, :dim]


def center_loss_ref(x, y, centers):
    """Pure-JAX reference matching the PyTorch forward (incl. buffer update)."""
    c = centers[y]
    diff = c - x
    loss = LOSS_WEIGHT * jnp.mean(jnp.sum(diff * diff, axis=1))
    z = jax.nn.one_hot(y, centers.shape[0], dtype=jnp.float32)
    n = jnp.sum(z, axis=0) + 1.0
    new_centers = centers - ALPHA * (z.T @ diff) / n[:, None]
    return loss, new_centers


if __name__ == "__main__":
    # Small shapes consistent with the module: 10 classes, 40-d features,
    # batch of 24 (pads to C=16 sublanes, D=128 lanes).
    nb_class, dim, batch = 10, 40, 24

    key = jax.random.PRNGKey(0)
    kx, ky = jax.random.split(key)
    x = jax.random.normal(kx, (batch, dim), dtype=jnp.float32)
    y = jax.random.randint(ky, (batch,), 0, nb_class, dtype=jnp.int32)

    # Per CenterLoss.__init__: the centers buffer starts as zeros.
    centers0 = jnp.zeros((nb_class, dim), dtype=jnp.float32)

    # Step 1: force a small batch tile so the multi-step accumulation and the
    # batch-padding path of the grid are exercised (grid = 2 steps).
    loss1, centers1 = center_loss(x, y, centers0, block_b=16)
    # Step 2: default (heuristic) tile with the updated, non-zero buffer.
    loss2, centers2 = center_loss(x, y, centers1)
    jax.block_until_ready((loss1, centers1, loss2, centers2))

    ref_loss1, ref_centers1 = center_loss_ref(x, y, centers0)
    ref_loss2, ref_centers2 = center_loss_ref(x, y, ref_centers1)

    assert np.allclose(np.asarray(loss1), np.asarray(ref_loss1), rtol=1e-5, atol=1e-5)
    assert np.allclose(np.asarray(centers1), np.asarray(ref_centers1), rtol=1e-5, atol=1e-5)
    assert np.allclose(np.asarray(loss2), np.asarray(ref_loss2), rtol=1e-5, atol=1e-5)
    assert np.allclose(np.asarray(centers2), np.asarray(ref_centers2), rtol=1e-5, atol=1e-5)

    print("KERNEL_OK")
</pallas_src>

<mosaic_0001>
module attributes {stable_mosaic.version = 11 : i64} {
  func.func @_center_loss_kernel(%arg0: i32, %arg1: memref<16x128xf32, #tpu.memory_space<vmem>>, %arg2: memref<16x1xi32, #tpu.memory_space<vmem>>, %arg3: memref<16x128xf32, #tpu.memory_space<vmem>>, %arg4: memref<1x1xf32, #tpu.memory_space<vmem>>, %arg5: memref<16x128xf32, #tpu.memory_space<vmem>>, %arg6: memref<16x128xf32, #tpu.memory_space<vmem>>, %arg7: memref<8x16xf32, #tpu.memory_space<vmem>>, %arg8: memref<1x1xf32, #tpu.memory_space<vmem>>) attributes {dimension_semantics = [#tpu.dimension_semantics<arbitrary>], iteration_bounds = array<i64: 2>, scalar_prefetch = 0 : i64, scratch_operands = 3 : i64, tpu.core_type = #tpu.core_type<tc>, window_params = [{transform_indices = @transform_0, window_bounds = array<i64: 16, 128>}, {transform_indices = @transform_1, window_bounds = array<i64: 16, 1>}, {pipeline_mode = #tpu.pipeline_mode<synchronous>, transform_indices = @transform_2, window_bounds = array<i64: 16, 128>}, {pipeline_mode = #tpu.pipeline_mode<synchronous>, transform_indices = @transform_3, window_bounds = array<i64: 1, 1>}, {pipeline_mode = #tpu.pipeline_mode<synchronous>, transform_indices = @transform_4, window_bounds = array<i64: 16, 128>}]} {
    %c0_i32 = arith.constant 0 : i32
    %0 = arith.cmpi eq, %arg0, %c0_i32 : i32
    %1 = arith.extui %0 : i1 to i32
    %c0_i32_0 = arith.constant 0 : i32
    %2 = arith.cmpi ne, %1, %c0_i32_0 : i32
    scf.if %2 {
      %cst_22 = arith.constant 0.000000e+00 : f32
      %35 = vector.broadcast %cst_22 : f32 to vector<16x128xf32>
      %c0_23 = arith.constant 0 : index
      %c0_24 = arith.constant 0 : index
      %36 = vector.load %arg6[%c0_23, %c0_24] : memref<16x128xf32, #tpu.memory_space<vmem>>, vector<16x128xf32>
      tpu.vector_store %arg6[%c0_23, %c0_24], %35 {strides = array<i32>} : memref<16x128xf32, #tpu.memory_space<vmem>>, vector<16x128xf32>,
      %cst_25 = arith.constant 0.000000e+00 : f32
      %37 = vector.broadcast %cst_25 : f32 to vector<8x16xf32>
      %c0_26 = arith.constant 0 : index
      %c0_27 = arith.constant 0 : index
      %38 = vector.load %arg7[%c0_26, %c0_27] : memref<8x16xf32, #tpu.memory_space<vmem>>, vector<8x16xf32>
      tpu.vector_store %arg7[%c0_26, %c0_27], %37 {strides = array<i32>} : memref<8x16xf32, #tpu.memory_space<vmem>>, vector<8x16xf32>,
      %cst_28 = arith.constant 0.000000e+00 : f32
      %39 = vector.broadcast %cst_28 : f32 to vector<1x1xf32>
      %c0_29 = arith.constant 0 : index
      %c0_30 = arith.constant 0 : index
      %40 = vector.load %arg8[%c0_29, %c0_30] : memref<1x1xf32, #tpu.memory_space<vmem>>, vector<1x1xf32>
      tpu.vector_store %arg8[%c0_29, %c0_30], %39 {strides = array<i32>} : memref<1x1xf32, #tpu.memory_space<vmem>>, vector<1x1xf32>,
    } else {
    }
    %c0 = arith.constant 0 : index
    %c0_1 = arith.constant 0 : index
    %3 = vector.load %arg1[%c0, %c0_1] : memref<16x128xf32, #tpu.memory_space<vmem>>, vector<16x128xf32>
    %c0_2 = arith.constant 0 : index
    %c0_3 = arith.constant 0 : index
    %4 = vector.load %arg2[%c0_2, %c0_3] : memref<16x1xi32, #tpu.memory_space<vmem>>, vector<16x1xi32>
    %c0_4 = arith.constant 0 : index
    %c0_5 = arith.constant 0 : index
    %5 = vector.load %arg3[%c0_4, %c0_5] : memref<16x128xf32, #tpu.memory_space<vmem>>, vector<16x128xf32>
    %6 = tpu.iota {dimensions = array<i32: 1>} : vector<16x16xi32>
    %7 = vector.broadcast %4 : vector<16x1xi32> to vector<16x16xi32>
    %8 = arith.cmpi eq, %6, %7 : vector<16x16xi32>
    %9 = arith.extui %8 : vector<16x16xi1> to vector<16x16xi32>
    %10 = arith.sitofp %9 : vector<16x16xi32> to vector<16x16xf32>
    %cst = arith.constant dense<0.000000e+00> : vector<16x128xf32>
    %11 = tpu.matmul %10, %5, %cst {dimension_numbers = #tpu.dot_dimension_numbers<[1], [0], [0], [1], [0, 0, 1, 1], [], []>} : vector<16x16xf32>, vector<16x128xf32>, vector<16x128xf32> -> vector<16x128xf32>
    %12 = arith.subf %11, %3 : vector<16x128xf32>
    %c0_6 = arith.constant 0 : index
    %c0_7 = arith.constant 0 : index
    %13 = vector.load %arg8[%c0_6, %c0_7] : memref<1x1xf32, #tpu.memory_space<vmem>>, vector<1x1xf32>
    %14 = arith.mulf %12, %12 : vector<16x128xf32>
    %15 = vector.shape_cast %14 : vector<16x128xf32> to vector<1x16x128xf32>
    %cst_8 = arith.constant dense<0.000000e+00> : vector<1xf32>
    %16 = vector.multi_reduction <add>, %15, %cst_8 [1, 2] : vector<1x16x128xf32> to vector<1xf32>
    %17 = vector.shape_cast %16 : vector<1xf32> to vector<1x1x1xf32>
    %18 = vector.extract %17[0, 0, 0] : f32 from vector<1x1x1xf32>
    %19 = vector.broadcast %18 : f32 to vector<1x1xf32>
    %20 = arith.addf %13, %19 : vector<1x1xf32>
    %c0_9 = arith.constant 0 : index
    %c0_10 = arith.constant 0 : index
    %21 = vector.load %arg8[%c0_9, %c0_10] : memref<1x1xf32, #tpu.memory_space<vmem>>, vector<1x1xf32>
    tpu.vector_store %arg8[%c0_9, %c0_10], %20 {strides = array<i32>} : memref<1x1xf32, #tpu.memory_space<vmem>>, vector<1x1xf32>,
    %c0_11 = arith.constant 0 : index
    %c0_12 = arith.constant 0 : index
    %22 = vector.load %arg6[%c0_11, %c0_12] : memref<16x128xf32, #tpu.memory_space<vmem>>, vector<16x128xf32>
    %cst_13 = arith.constant dense<0.000000e+00> : vector<16x128xf32>
    %23 = tpu.matmul %10, %12, %cst_13 {dimension_numbers = #tpu.dot_dimension_numbers<[0], [0], [1], [1], [0, 1, 1, 1], [], []>} : vector<16x16xf32>, vector<16x128xf32>, vector<16x128xf32> -> vector<16x128xf32>
    %24 = arith.addf %22, %23 : vector<16x128xf32>
    %c0_14 = arith.constant 0 : index
    %c0_15 = arith.constant 0 : index
    %25 = vector.load %arg6[%c0_14, %c0_15] : memref<16x128xf32, #tpu.memory_space<vmem>>, vector<16x128xf32>
    tpu.vector_store %arg6[%c0_14, %c0_15], %24 {strides = array<i32>} : memref<16x128xf32, #tpu.memory_space<vmem>>, vector<16x128xf32>,
    %c0_16 = arith.constant 0 : index
    %c0_17 = arith.constant 0 : index
    %26 = vector.load %arg7[%c0_16, %c0_17] : memref<8x16xf32, #tpu.memory_space<vmem>>, vector<8x16xf32>
    %cst_18 = arith.constant dense<0.000000e+00> : vector<16xf32>
    %27 = vector.multi_reduction <add>, %10, %cst_18 [0] : vector<16x16xf32> to vector<16xf32>
    %28 = vector.shape_cast %27 : vector<16xf32> to vector<1x16xf32>
    %29 = vector.broadcast %28 : vector<1x16xf32> to vector<8x16xf32>
    %30 = arith.addf %26, %29 : vector<8x16xf32>
    %c0_19 = arith.constant 0 : index
    %c0_20 = arith.constant 0 : index
    %31 = vector.load %arg7[%c0_19, %c0_20] : memref<8x16xf32, #tpu.memory_space<vmem>>, vector<8x16xf32>
    tpu.vector_store %arg7[%c0_19, %c0_20], %30 {strides = array<i32>} : memref<8x16xf32, #tpu.memory_space<vmem>>, vector<8x16xf32>,
    %c1_i32 = arith.constant 1 : i32
    %32 = arith.cmpi eq, %arg0, %c1_i32 : i32
    %33 = arith.extui %32 : i1 to i32
    %c0_i32_21 = arith.constant 0 : i32
    %34 = arith.cmpi ne, %33, %c0_i32_21 : i32
    scf.if %34 {
      %c0_22 = arith.constant 0 : index
      %c0_23 = arith.constant 0 : index
      %35 = vector.load %arg8[%c0_22, %c0_23] : memref<1x1xf32, #tpu.memory_space<vmem>>, vector<1x1xf32>
      %cst_24 = arith.constant 4.16666677E-4 : f32
      %36 = vector.broadcast %cst_24 : f32 to vector<1x1xf32>
      %37 = arith.mulf %36, %35 : vector<1x1xf32>
      %c0_25 = arith.constant 0 : index
      %c0_26 = arith.constant 0 : index
      %38 = vector.load %arg4[%c0_25, %c0_26] : memref<1x1xf32, #tpu.memory_space<vmem>>, vector<1x1xf32>
      tpu.vector_store %arg4[%c0_25, %c0_26], %37 {strides = array<i32>} : memref<1x1xf32, #tpu.memory_space<vmem>>, vector<1x1xf32>,
      %c0_27 = arith.constant 0 : index
      %c0_28 = arith.constant 0 : index
      %39 = vector.load %arg7[%c0_27, %c0_28] : memref<8x16xf32, #tpu.memory_space<vmem>>, vector<8x16xf32>
      %40 = tpu.transpose %39, [1, 0] : vector<8x16xf32> -> vector<16x8xf32>
      %41 = vector.extract_strided_slice %40 {offsets = [0, 0], sizes = [16, 1], strides = [1, 1]} : vector<16x8xf32> to vector<16x1xf32>
      %cst_29 = arith.constant 1.000000e+00 : f32
      %42 = vector.broadcast %cst_29 : f32 to vector<16x1xf32>
      %43 = arith.addf %41, %42 : vector<16x1xf32>
      %cst_30 = arith.constant 5.000000e-02 : f32
      %44 = vector.broadcast %cst_30 : f32 to vector<16x1xf32>
      %45 = arith.divf %44, %43 : vector<16x1xf32>
      %c0_31 = arith.constant 0 : index
      %c0_32 = arith.constant 0 : index
      %46 = vector.load %arg6[%c0_31, %c0_32] : memref<16x128xf32, #tpu.memory_space<vmem>>, vector<16x128xf32>
      %47 = vector.broadcast %45 : vector<16x1xf32> to vector<16x128xf32>
      %48 = arith.mulf %46, %47 : vector<16x128xf32>
      %49 = arith.subf %5, %48 : vector<16x128xf32>
      %c0_33 = arith.constant 0 : index
      %c0_34 = arith.constant 0 : index
      %50 = vector.load %arg5[%c0_33, %c0_34] : memref<16x128xf32, #tpu.memory_space<vmem>>, vector<16x128xf32>
      tpu.vector_store %arg5[%c0_33, %c0_34], %49 {strides = array<i32>} : memref<16x128xf32, #tpu.memory_space<vmem>>, vector<16x128xf32>,
    } else {
    }
    return
  }
  func.func @transform_0(%arg0: i32) -> (i32, i32) {
    %c0_i32 = arith.constant 0 : i32
    %c0_i32_0 = arith.constant 0 : i32
    return %arg0, %c0_i32 : i32, i32
  }
  func.func @transform_1(%arg0: i32) -> (i32, i32) {
    %c0_i32 = arith.constant 0 : i32
    %c0_i32_0 = arith.constant 0 : i32
    return %arg0, %c0_i32 : i32, i32
  }
  func.func @transform_2(%arg0: i32) -> (i32, i32) {
    %c0_i32 = arith.constant 0 : i32
    %c0_i32_0 = arith.constant 0 : i32
    %c0_i32_1 = arith.constant 0 : i32
    return %c0_i32, %c0_i32_0 : i32, i32
  }
  func.func @transform_3(%arg0: i32) -> (i32, i32) {
    %c0_i32 = arith.constant 0 : i32
    %c0_i32_0 = arith.constant 0 : i32
    %c0_i32_1 = arith.constant 0 : i32
    return %c0_i32, %c0_i32_0 : i32, i32
  }
  func.func @transform_4(%arg0: i32) -> (i32, i32) {
    %c0_i32 = arith.constant 0 : i32
    %c0_i32_0 = arith.constant 0 : i32
    %c0_i32_1 = arith.constant 0 : i32
    return %c0_i32, %c0_i32_0 : i32, i32
  }
}

</mosaic_0001>

<bundles_post_ra>
// kernel: center_loss.1
= control target key start
LH: loop header
LB: loop body
LE: loop exit
PB: predicated region body
PF: predicated region fallthrough
CT: control target
= control target key end

     0   :  { %10 = vsyncpa [#allocation6], 0  ;;  %s743_s15 = smov 0   ;;  %s821_s0 = inlined_call_operand.vmem [shape: f32[32,128], index: 0, kind: input, shape index: {}]   ;;  %s822_s1 = inlined_call_operand.vmem [shape: s32[32,1], index: 1, kind: input, shape index: {}]   ;;  %s823_s2 = inlined_call_operand.vmem [shape: f32[16,128], index: 2, kind: input, shape index: {}, may-alias: {2,4}]   ;;  %s824_s3 = inlined_call_operand.hbm [shape: f32[1,1], index: 3, kind: output, shape index: {0}]   ;;  %s825_s4 = inlined_call_operand.vmem [shape: f32[16,128], index: 4, kind: output, shape index: {1}, may-alias: {2,4}]  }
   0x1 LB: > { %s749_s16 = sadd.s32 4294967295, %s711_s15   ;;  %p599_p0 = scmp.ge.s32.totalorder %s711_s15, 1  ;;  %s711_s15 = sphi %s743_s15, %s16_s15  }
   0x2   : > { %p168_p1 = scmp.lt.s32.totalorder %s711_s15, 3 }
   0x4   : > { %p169_p2 = pnand %p599_p0, %p168_p1 }
   0x5   : > { %s600_s17 = sshll.u32 (!%p169_p2), %s749_s16, 1  ;;  %p604_p4 = scmp.ne.s32.totalorder (!%p169_p2), %s749_s16, 0 }
   0x6   : > { %172 = sbr.rel (%p169_p2) target bundleno = 726 (0x2d6), region = 32  ;;  %p195_p3 = scmp.lt.s32.totalorder (!%p169_p2), %s600_s17, 3 }
   0xd   : > { %s827_s17 = smov (!%p195_p3, %s600_s17), 3  ;;  %209 = sbr.rel (%p604_p4) target bundleno = 20 (0x14), region = 36 }
   0xe   : > { %s601_s18 = sshll.u32 %s827_s17, 3  ;;  %vm212_vm0 = vcmask (!%p604_p4), 130048   ;;  %vm214_vm1 = vcmask (!%p604_p4), 0   ;;  %v713_v0 = vmov (!%p604_p4), 0.0  }
   0xf   : > { %s757_s21 = scalar_lea.vmem %s821_s0, %s601_s18  ;;  %s204_s24 = scalar_lea.vmem %s822_s1, %s601_s18  ;;  %210 = vst [vmem:[#allocation2] sm:$0xff] (!%p604_p4), %v713_v0  ;;  %211 = vst [vmem:[#allocation2 + $0x8] sm:$0xff] (!%p604_p4), %v713_v0 }
  0x10   : > { %213 = vst.msk [vmem:[#allocation3] sm:$0xff] (!%p604_p4), %vm212_vm0, %v713_v0 }
  0x11   : > { %215 = vst.msk [vmem:[#allocation4] sm:$0x1] (!%p604_p4), %vm214_vm1, %v713_v0 }
  0x14 PF: > { %v218_v1 = vld [vmem:[%s204_s24] sm:$0xff]  ;;  %v714_v2 = vmov 0   ;;  %v771_v4 = vld [vmem:[%s823_s2 + $0x8] sm:$0xff]  ;;  %v222_v7 = vlaneseq  ;;  %vm236_vm2 = vcmask 130048   ;;  %v715_v10 = vmov 0.0   ;;  %p611_p5 = scmp.ne.s32.totalorder %s749_s16, 1 }
  0x15   : > { %668 = vset.pattern.permute.xlu0 %v714_v2  ;;  %v766_v3 = vld [vmem:[%s823_s2] sm:$0xff]  ;;  %v219_v6 = vld [vmem:[%s204_s24 + $0x8] sm:$0xff]  ;;  %vm335_vm5 = vcmask 0   ;;  %v716_v54 = vmov (!%p611_p5), 0  }
  0x16   : > { %225 = vperm.xlu0 %668, %v218_v1   ;;  %v638_v5 = vpack.c.bf16 %v771_v4, %v766_v3  ;;  %v223_v8 = vand.u32 127, %v222_v7  ;;  %v217_v26 = vld [vmem:[%s757_s21 + $0x8] sm:$0xff]  ;;  %v216_v27 = vld [vmem:[%s757_s21] sm:$0xff] }
  0x17   : > { %v456_v22 = vld [vmem:[#allocation3] sm:$0xff]  ;;  %v338_v47 = vld [vmem:[#allocation2 + $0x8] sm:$0xff]  ;;  %v337_v48 = vld [vmem:[#allocation2] sm:$0xff] }
  0x18   : > { %639 = vmatprep.subr.bf16.mxu0 %v638_v5  ;;  %v320_v44 = vld [vmem:[#allocation4] sm:$0x1] }
  0x19   : > { %641 = vmatpush3.bf16.msra.mxu0 %v638_v5 }
  0x1a   : > { %228 = vperm.xlu0 %668, %v219_v6  }
  0x95   : > { %v226_v9 = vpop.permute.xlu0 %225 }
  0x96   : > { %vm230_vm3 = vcmp.eq.s32.totalorder %v223_v8, %v226_v9 }
  0x97   : > { %v605_v11 = vsel %vm230_vm3, 1.0, %v715_v10 }
  0x98   : > { %339 = vxpose.xlu1.b32.start [1/2] (short) (narrow) %v605_v11, 16  ;;  %628 = vmatprep.mubr.msk.f32.mxu0 %vm236_vm2, %v605_v11  ;;  %v457_v14 = vsel %vm236_vm2, %v605_v11, 0.0 }
  0x99   : > { %v229_v12 = vpop.permute.xlu0 %228 }
  0x9a   : > { %vm231_vm4 = vcmp.eq.s32.totalorder %v223_v8, %v229_v12 }
  0x9b   : > { %v606_v13 = vsel %vm231_vm4, 1.0, %v715_v10 }
  0x9c   : > { %v458_v15 = vsel %vm236_vm2, %v606_v13, 0.0  ;;  %340 = vxpose.xlu1.b32.end [2/2] (short) (narrow) %v606_v13, 16  ;;  %629 = vmatmul.mubr.msk.f32.vlgmr.msra.gmra.mrb[0].mxu0 %vm236_vm2, %v606_v13 }
  0x9d   : > { %v459_v16 = vadd.f32 %v458_v15, %v457_v14 }
  0x9f   : > { %v460_v17 = vrot.slane %v459_v16, 4 }
  0xa1   : > { %v461_v18 = vadd.f32 %v460_v17, %v459_v16 }
  0xa3   : > { %v462_v19 = vrot.slane %v461_v18, 2 }
  0xa5   : > { %v463_v20 = vadd.f32 %v462_v19, %v461_v18 }
  0xa7   : > { %v464_v21 = vrot.slane %v463_v20, 1 }
  0xa9   : > { %v465_v23 = vadd.f32 %v464_v21, %v463_v20 }
  0xab   : > { %v466_v24 = vadd.f32 %v465_v23, %v456_v22 }
  0xad   : > { %467 = vst.msk [vmem:[#allocation3] sm:$0xff] %vm236_vm2, %v466_v24 }
  0xb4   : > { %v475_v53 = vld [vmem:[#allocation3] sm:$0xff] (!%p611_p5) }
  0xba   : > { %670 = vset.pattern.permute.xlu1 (!%p611_p5), %v716_v54 }
 0x118   : > { %v355_v25 = vpop.trf.xlu1 }
 0x119   : > { %635 = vmatprep.mubr.msk.f32.mxu1 %vm236_vm2, %v355_v25 }
 0x11c   : > { %v356_v36 = vpop.trf.xlu1 }
 0x16f   : > { %v630_v28 = vpop.f32.mrb[0].mxu0 }
 0x170   : > { %v319_v29 = vsub.f32 %v630_v28, %v217_v26  ;;  %v309_v30 = vpop.f32.mrb[1].mxu0 }
 0x171   : > { %v318_v31 = vsub.f32 %v309_v30, %v216_v27 }
 0x172   : > { %v322_v32 = vmul.f32 %v319_v29, %v319_v29 }
 0x173   : > { %v321_v33 = vmul.f32 %v318_v31, %v318_v31  ;;  %v642_v34 = vpack.c.bf16 %v319_v29, %v318_v31 }
 0x175   : > { %643 = vmatprep.subr.bf16.mxu1 %v642_v34  ;;  %v323_v35 = vadd.f32 %v322_v32, %v321_v33 }
 0x176   : > { %645 = vmatpush3.bf16.msra.mxu1 %v642_v34 }
 0x177   : > { %324 = vadd.xlane.f32.xlu0 %v323_v35 }
 0x179   : > { %636 = vmatmul.mubr.msk.f32.vlgmr.msra.gmra.mrb[0].mxu1 %vm236_vm2, %v356_v36 }
 0x1a4   : > { %476 = vxpose.xlu0.b32.start.end [1/1] (short) (narrow) (!%p611_p5), %v475_v53, 16 }
 0x1cd   : > { %669 = vset.pattern.permute.xlu0 (!%p611_p5), %v716_v54 }
 0x204   : > { %v325_v37 = vpop.xlane.xlu0 %324 }
 0x205   : > { %v326_v38 = vrot.slane %v325_v37, 4 }
 0x207   : > { %v327_v39 = vadd.f32 %v326_v38, %v325_v37 }
 0x209   : > { %v328_v40 = vrot.slane %v327_v39, 2 }
 0x20b   : > { %v329_v41 = vadd.f32 %v328_v40, %v327_v39 }
 0x20d   : > { %v330_v42 = vrot.slane %v329_v41, 1 }
 0x20f   : > { %v331_v43 = vadd.f32 %v330_v42, %v329_v41 }
 0x211   : > { %646 = vpush %v331_v43 }
 0x224   : > { %v492_v55 = vpop.trf.xlu0 (!%p611_p5) }
 0x225   : > { %v508_v56 = vadd.f32 (!%p611_p5), 1.0, %v492_v55 }
 0x227   : > { %671 = vrcp.f32 (!%p611_p5), %v508_v56 }
 0x228   : > { %v493_v57 = vpop.trf.xlu0 (!%p611_p5) }
 0x229   : > { %v509_v58 = vadd.f32 (!%p611_p5), 1.0, %v493_v57 }
 0x22b   : > { %673 = vrcp.f32 (!%p611_p5), %v509_v58 }
 0x231   : > { %v672_v59 = vpop.eup (!%p611_p5), %671 }
 0x232   : > { %v511_v60 = vmul.f32 (!%p611_p5), 0.05, %v672_v59 }
 0x234   : > { %518 = vperm.xlu0 (!%p611_p5), %669, %v511_v60  }
 0x235   : > { %v674_v61 = vpop.eup (!%p611_p5), %673 }
 0x236   : > { %v513_v62 = vmul.f32 (!%p611_p5), 0.05, %v674_v61 }
 0x238   : > { %523 = vperm.xlu1 (!%p611_p5), %670, %v513_v62  }
 0x242   : > { %s647_s29 = spop %646 }
 0x243   : > { %v333_v45 = vstv %s647_s29 }
 0x244   : > { %v334_v46 = vadd.f32 %v333_v45, %v320_v44 }
 0x246   : > { %336 = vst.msk [vmem:[#allocation4] sm:$0x1] %vm335_vm5, %v334_v46 }
 0x24a   : > { %471 = sbr.rel (%p611_p5) target bundleno = 701 (0x2bd), region = 40 }
 0x24c   : > { %v637_v49 = vpop.f32.mrb[0].mxu1 }
 0x24d   : > { %v453_v50 = vadd.f32 %v637_v49, %v338_v47  ;;  %v443_v51 = vpop.f32.mrb[1].mxu1  ;;  %v472_v63 = vld [vmem:[#allocation4] sm:$0x1] (!%p611_p5) }
 0x24e   : > { %v452_v52 = vadd.f32 %v443_v51, %v337_v48  ;;  %v473_v0 = vmul.f32 (!%p611_p5), 0.00041666668, %v472_v63 }
 0x24f   : > { %455 = vst [vmem:[#allocation2 + $0x8] sm:$0xff] %v453_v50 }
 0x250   : > { %454 = vst [vmem:[#allocation2] sm:$0xff] %v452_v52  ;;  %474 = vst.msk [vmem:[#allocation5] sm:$0x1] (!%p611_p5), %vm335_vm5, %v473_v0 }
 0x256   : > { %v515_v6 = vld [vmem:[#allocation2 + $0x8] sm:$0xff] }
 0x257   : > { %v514_v1 = vld [vmem:[#allocation2] sm:$0xff] }
 0x2b3   : > { %v519_v2 = vpop.permute.xlu0 %518 }
 0x2b4   : > { %v526_v5 = vmul.f32 %v519_v2, %v514_v1 }
 0x2b6   : > { %v528_v7 = vsub.f32 %v766_v3, %v526_v5 }
 0x2b7   : > { %v524_v8 = vpop.permute.xlu1 %523 }
 0x2b8   : > { %530 = vst [vmem:[%s825_s4] sm:$0xff] %v528_v7  ;;  %v527_v9 = vmul.f32 %v524_v8, %v515_v6 }
 0x2ba   : > { %v529_v10 = vsub.f32 %v771_v4, %v527_v9 }
 0x2bc   : > { %531 = vst [vmem:[%s825_s4 + $0x8] sm:$0xff] %v529_v10 }
 0x2bd PF: > { %p652_p6 = scmp.eq.s32.totalorder %s749_s16, 1  ;;  %s717_s8 = smov [#allocation5]  }
 0x2be   : > { %s539_s9 = sshll.u32 %s717_s8, 4  ;;  %s540_s9 = int_to_ptr.vmem [resolvable:$true] %s539_s9 }
 0x2bf   : > { %s675_s10 = scalar_lea.vmem %s540_s9, 16  ;;  %s681_s11 = scalar_lea.vmem %s540_s9, 32 }
 0x2c0   : > { %p676_p7 = scmp.ne.s32.totalorder %s540_s9, %s675_s10  ;;  %p682_p10 = scmp.lt.s32.totalorder %s540_s9, %s540_s9 }
 0x2c1   : > { %p683_p11 = scmp.lt.s32.totalorder %s681_s11, %s675_s10 }
 0x2c2   : > { %p677_p8 = pnand %p676_p7, %p652_p6 }
 0x2c3   : > { %p684_p12 = por %p683_p11, %p682_p10 }
 0x2c4   : > { %p678_p9 = pneg %p677_p8 }
 0x2c6   : > { %p685_p13 = pnand %p684_p12, %p678_p9 }
 0x2c8   : > { %688 = shalt.err (!%p685_p13)
}
 0x2c9   : > { %s689_s14 = scalar_lea.hbm %s824_s3, 16 }
 0x2ca   : > { %p690_p0 = scmp.ne.s32.totalorder %s824_s3, %s689_s14  ;;  %p695_p3 = scmp.lt.u32.totalorder %s689_s14, %s824_s3 }
 0x2cc   : > { %p691_p1 = pnand %p690_p0, %p652_p6 }
 0x2ce   : > { %p692_p2 = pneg %p691_p1 }
 0x2d0   : > { %p697_p4 = pnand %p695_p3, %p692_p2 }
 0x2d2   : > { %700 = shalt.err (!%p697_p4)
}
 0x2d3   : > { %649 = dma.vmem_to_hbm [thread:$0]  (%p652_p6), %s540_s9, 16, %s824_s3, [#allocation6]  }
 0x2d4   : > { %706 = dma.done.wait (%p652_p6), [#allocation6], 16  }
 0x2d5   : > { %708 = vsyncadd (%p652_p6), [#allocation6], 4294967280 }
 0x2d6 PF: > { %s16_s15 = sadd.s32 1, %s711_s15  }
 0x2d7   : > { %p13_p5 = scmp.ge.s32.totalorder %s16_s15, 4  }
 0x2d9   :  { %15 = sbr.rel (!%p13_p5) target bundleno = 1 (0x1), region = 78 }
 0x2e0   :  { %558 = vsyncpa [#allocation6], 1 }
 0x2e1   :  { %560 = vsyncpa [#allocation6 + $0x1], 1 }

</bundles_post_ra>
